<compile_context>
chip_gen: v5e
topology: v5e:2x2
jax: 0.10.0
libtpu: 0.0.40
codegen_flags: <defaults>
</compile_context>

<pallas_src>
import functools

import jax
import jax.numpy as jnp
from jax.experimental import pallas as pl
from jax.experimental.pallas import tpu as pltpu


def _round_up(x, m):
    return ((x + m - 1) // m) * m


# ----------------------------- group (glue) ---------------------------------
class ZqGroup:
    """Minimal stand-in for the lattice symmetry group: provides the default
    value table for an energy term (deterministic, no checkpoint load)."""

    def __init__(self, q: int):
        self.q = q

    def default_val_table(self):
        # e.g. Potts/Ising-like on-site values: v -> cos(2*pi*v/q)
        v = jnp.arange(self.q, dtype=jnp.float32)
        return jnp.cos(2.0 * jnp.pi * v / self.q)


# ----------------------------- Pallas kernel --------------------------------
def _energy_kernel(val_ref, lat_ref, out_ref, *, q: int, hw: int, ts: int):
    """Grid = (batch_tiles, site_tiles); the site axis (last) is the reduction.

    val_ref SMEM (q,)       f32          value table
    lat_ref VMEM (tb, ts)   int8/int32   lattice spins (native dtype, no widen)
    out_ref VMEM (tb, 128)  f32          lane-dense per-row partial sums,
                                         VMEM-resident across the site axis
    """
    s = pl.program_id(1)
    ns = pl.num_programs(1)

    @pl.when(s == 0)
    def _():
        out_ref[...] = jnp.zeros_like(out_ref)

    lat = lat_ref[...]                       # compare at native width

    # Balanced select tree: (q-1) compares + (q-1) selects per element.
    # Out-of-range spins clamp to the nearest table entry.
    # TODO(synk): for large q (>= ~16) a VMEM gather / one-hot MXU dot beats
    # the O(q) tree; not needed for the small tables used here.
    # TODO(synk): optional bf16 select tree for v6e/v7x (f32 kept for accuracy
    # and v5e compatibility).
    def lookup(lo, hi):
        if hi - lo == 1:
            return val_ref[lo]               # SMEM scalar, broadcast by where
        mid = (lo + hi) // 2
        return jnp.where(lat < mid, lookup(lo, mid), lookup(mid, hi))

    if q == 1:
        vals = jnp.full(lat.shape, val_ref[0], dtype=jnp.float32)
    else:
        vals = lookup(0, q)

    def lane_accumulate(v):
        # Fold the (tb, ts) tile into (tb, 128): static lane-aligned slices +
        # vreg-wise adds only (no cross-lane XLU traffic, no lane-sparse store).
        part = v[:, 0:128]
        for c in range(1, ts // 128):
            part = part + v[:, c * 128:(c + 1) * 128]
        out_ref[...] += part

    if hw % ts != 0:
        # Only the ragged last site tile pays the pad mask (its out-of-range
        # columns hold undefined edge-block data and must be zeroed).
        last = ns - 1

        @pl.when(s == last)
        def _():
            col = jax.lax.broadcasted_iota(jnp.int32, lat.shape, 1)
            lane_accumulate(jnp.where(s * ts + col < hw, vals, 0.0))

        @pl.when(s != last)
        def _():
            lane_accumulate(vals)
    else:
        lane_accumulate(vals)


# --------------------------- tiling / call builder ---------------------------
_SUBLANE = {1: 32, 2: 16, 4: 8}   # native sublane granularity per itemsize


def _choose_tiles(b, hw, batch_tile, site_tile, itemsize):
    g = _SUBLANE.get(int(itemsize), 8)
    # Site tile: lane-dense multiple of 128; 4096 keeps the double-buffered
    # int32 tile + f32 temporaries comfortably inside v7x's VMEM budget while
    # amortizing the ~0.35 us/step grid overhead.
    if site_tile is None:
        site_tile = 4096
    ts = min(_round_up(int(site_tile), 128), _round_up(hw, 128))
    # Batch tile: either the full (small) batch extent, or a sublane-aligned
    # tile capped so the parallel batch axis has >= 2 blocks (both v7x TCs).
    if batch_tile is None:
        batch_tile = 128
    if b <= g:
        tb = b
    else:
        tb = min(_round_up(int(batch_tile), g), _round_up((b + 1) // 2, g))
    return tb, ts


@functools.lru_cache(maxsize=None)
def _build_energy_call(q, b, hw, tb, ts, lat_dtype_name):
    kernel = functools.partial(_energy_kernel, q=q, hw=hw, ts=ts)
    grid = (pl.cdiv(b, tb), pl.cdiv(hw, ts))
    itemsize = jnp.dtype(lat_dtype_name).itemsize
    return pl.pallas_call(
        kernel,
        out_shape=jax.ShapeDtypeStruct((b, 128), jnp.float32),
        grid_spec=pltpu.PrefetchScalarGridSpec(
            num_scalar_prefetch=0,
            grid=grid,
            in_specs=[
                pl.BlockSpec(memory_space=pltpu.MemorySpace.SMEM),   # val_table (q,)
                pl.BlockSpec((tb, ts), lambda bi, si: (bi, si)),     # lattice tile
            ],
            out_specs=pl.BlockSpec((tb, 128), lambda bi, si: (bi, 0)),
        ),
        compiler_params=pltpu.CompilerParams(
            dimension_semantics=("parallel", "arbitrary"),   # batch across TCs
        ),
        cost_estimate=pl.CostEstimate(
            flops=2 * max(q - 1, 1) * b * hw,
            transcendentals=0,
            bytes_accessed=itemsize * b * hw + 4 * b * 128 + 4 * q,
        ),
    )


def _energy_pallas(lattice, val_table, strength, *, batch_tile=None, site_tile=None):
    """E[b] = strength * sum_sites val_table[lattice[b, ...]] via Pallas."""
    val_table = jnp.asarray(val_table, dtype=jnp.float32)
    q = int(val_table.shape[0])
    b = int(lattice.shape[0])
    # Stream the lattice as-is (reshape is metadata-only): no extra cast/pad
    # pass over HBM. int8 and int32 lattices run natively in the kernel;
    # ragged batch/site edges are handled by Pallas edge blocks + in-kernel
    # masking of the last site tile (batch tail rows are simply not written).
    lat = jnp.reshape(lattice, (b, -1))
    if lat.dtype not in (jnp.dtype(jnp.int8), jnp.dtype(jnp.int32)):
        lat = lat.astype(jnp.int32)
    if q > 127 and lat.dtype == jnp.dtype(jnp.int8):
        lat = lat.astype(jnp.int32)          # tree constants would overflow int8
    hw = int(lat.shape[1])
    tb, ts = _choose_tiles(b, hw, batch_tile, site_tile, lat.dtype.itemsize)
    partial = _build_energy_call(q, b, hw, tb, ts, lat.dtype.name)(val_table, lat)
    # Tiny final cross-lane reduce + strength scale stay in XLA on (B, 128).
    return jnp.float32(strength) * jnp.sum(partial, axis=1)


# ----------------------------- module wrappers --------------------------------
class EnergyTerm:
    """JAX/Pallas analogue of the PyTorch EnergyTerm."""

    def __init__(self, val_table=None):
        self.strength = 1.0
        self.val_table = None if val_table is None else jnp.asarray(
            val_table, dtype=jnp.float32)

    def __mul__(self, other):
        self.strength *= other
        return self

    __rmul__ = __mul__

    def __neg__(self):
        return self * -1

    def __add__(self, other):
        if isinstance(other, EnergyTerm):
            return EnergyTerms([self, other])
        if isinstance(other, EnergyTerms):
            other.append(self)
            return other
        return NotImplemented

    __radd__ = __add__

    def __sub__(self, other):
        return self + (-other)

    def __call__(self, lattice, group, *, batch_tile=None, site_tile=None):
        # Lazy default of the value table, as in the PyTorch forward.
        if self.val_table is None:
            self.val_table = group.default_val_table()
        return _energy_pallas(lattice, self.val_table, float(self.strength),
                              batch_tile=batch_tile, site_tile=site_tile)


class EnergyTerms(list):
    """Sum of energy terms."""

    def __mul__(self, other):
        for term in self:
            term * other          # in-place strength scaling (torch semantics)
        return self

    __rmul__ = __mul__

    def __neg__(self):
        return self * -1

    def __call__(self, lattice, group, *, batch_tile=None, site_tile=None):
        if len(self) == 0:
            return jnp.zeros((lattice.shape[0],), jnp.float32)
        # Resolve tables (lazy defaults, as in each term's forward).
        tables = []
        for term in self:
            if term.val_table is None:
                term.val_table = group.default_val_table()
            tables.append(jnp.asarray(term.val_table, jnp.float32))
        q0 = int(tables[0].shape[0])
        if all(int(t.shape[0]) == q0 for t in tables):
            # Fuse all terms: fold strengths into one combined table so the
            # lattice is streamed from HBM exactly once.
            combined = jnp.zeros((q0,), jnp.float32)
            for term, t in zip(self, tables):
                combined = combined + jnp.float32(term.strength) * t
            return _energy_pallas(lattice, combined, 1.0,
                                  batch_tile=batch_tile, site_tile=site_tile)
        # Fallback: terms defined over different groups / table sizes.
        return sum(term(lattice, group, batch_tile=batch_tile,
                        site_tile=site_tile) for term in self)


# ----------------------------------- main ------------------------------------
if __name__ == "__main__":
    key = jax.random.PRNGKey(0)

    B, H, W = 2, 16, 16
    Q = 4
    group = ZqGroup(Q)
    table = group.default_val_table()

    # Deterministic integer lattice configuration in [0, Q).
    lattice = jax.random.randint(key, (B, H, W), 0, Q, dtype=jnp.int32)

    # 1) Single term with scaled strength (exercises __mul__).
    term = EnergyTerm() * 2.0
    energy = jax.block_until_ready(term(lattice, group))           # (B,)
    ref = 2.0 * jnp.sum(table[lattice.reshape(B, -1)], axis=1)
    assert energy.shape == (B,)
    assert jnp.allclose(energy, ref, atol=1e-4, rtol=1e-5)

    # 2) Sum of terms, fused into a single pass over the lattice.
    custom = [0.3, -0.7, 1.1, 0.5]
    terms = EnergyTerms([EnergyTerm() * 2.0, -(EnergyTerm(custom) * 0.5)])
    energy2 = jax.block_until_ready(terms(lattice, group))
    ref2 = ref - 0.5 * jnp.sum(
        jnp.asarray(custom, jnp.float32)[lattice.reshape(B, -1)], axis=1)
    assert jnp.allclose(energy2, ref2, atol=1e-4, rtol=1e-5)

    # 3) Native int8 lattice path (compares run on int8, no widen in kernel).
    energy_i8 = jax.block_until_ready(term(lattice.astype(jnp.int8), group))
    assert jnp.allclose(energy_i8, ref, atol=1e-4, rtol=1e-5)

    # 4) Multi-tile path: 2 batch blocks (ragged), 4 site tiles (ragged last).
    B2, H2, W2 = 10, 40, 40                                        # HW = 1600
    lattice2 = jax.random.randint(jax.random.PRNGKey(1), (B2, H2, W2), 0, Q,
                                  dtype=jnp.int32)
    energy3 = jax.block_until_ready(
        EnergyTerm()(lattice2, group, site_tile=512))
    ref3 = jnp.sum(table[lattice2.reshape(B2, -1)], axis=1)
    assert energy3.shape == (B2,)
    assert jnp.allclose(energy3, ref3, atol=1e-4, rtol=1e-5)

    print("KERNEL_OK")
</pallas_src>

<mosaic_0001>
module attributes {stable_mosaic.version = 11 : i64} {
  func.func @_energy_kernel(%arg0: i32, %arg1: i32, %arg2: memref<4xf32, #tpu.memory_space<smem>>, %arg3: memref<2x256xi32, #tpu.memory_space<vmem>>, %arg4: memref<2x128xf32, #tpu.memory_space<vmem>>) attributes {dimension_semantics = [#tpu.dimension_semantics<parallel>, #tpu.dimension_semantics<arbitrary>], iteration_bounds = array<i64: 1, 1>, scalar_prefetch = 0 : i64, scratch_operands = 0 : i64, tpu.core_type = #tpu.core_type<tc>, window_params = [{transform_indices = @transform_0, window_bounds = array<i64: 4>}, {transform_indices = @transform_1, window_bounds = array<i64: 2, 256>}, {transform_indices = @transform_2, window_bounds = array<i64: 2, 128>}]} {
    %c0_i32 = arith.constant 0 : i32
    %0 = arith.cmpi eq, %arg1, %c0_i32 : i32
    %1 = arith.extui %0 : i1 to i32
    %c0_i32_0 = arith.constant 0 : i32
    %2 = arith.cmpi ne, %1, %c0_i32_0 : i32
    scf.if %2 {
      %cst = arith.constant 0.000000e+00 : f32
      %27 = vector.broadcast %cst : f32 to vector<2x128xf32>
      %c0_7 = arith.constant 0 : index
      %c0_8 = arith.constant 0 : index
      %28 = vector.load %arg4[%c0_7, %c0_8] : memref<2x128xf32, #tpu.memory_space<vmem>>, vector<2x128xf32>
      tpu.vector_store %arg4[%c0_7, %c0_8], %27 {strides = array<i32>} : memref<2x128xf32, #tpu.memory_space<vmem>>, vector<2x128xf32>,
    } else {
    }
    %c0 = arith.constant 0 : index
    %c0_1 = arith.constant 0 : index
    %3 = vector.load %arg3[%c0, %c0_1] : memref<2x256xi32, #tpu.memory_space<vmem>>, vector<2x256xi32>
    %c2_i32 = arith.constant 2 : i32
    %4 = vector.broadcast %c2_i32 : i32 to vector<2x256xi32>
    %5 = arith.cmpi slt, %3, %4 : vector<2x256xi32>
    %c1_i32 = arith.constant 1 : i32
    %6 = vector.broadcast %c1_i32 : i32 to vector<2x256xi32>
    %7 = arith.cmpi slt, %3, %6 : vector<2x256xi32>
    %c0_2 = arith.constant 0 : index
    %8 = memref.load %arg2[%c0_2] : memref<4xf32, #tpu.memory_space<smem>>
    %c1 = arith.constant 1 : index
    %9 = memref.load %arg2[%c1] : memref<4xf32, #tpu.memory_space<smem>>
    %10 = vector.broadcast %8 : f32 to vector<2x256xf32>
    %11 = vector.broadcast %9 : f32 to vector<2x256xf32>
    %12 = arith.select %7, %10, %11 : vector<2x256xi1>, vector<2x256xf32>
    %c3_i32 = arith.constant 3 : i32
    %13 = vector.broadcast %c3_i32 : i32 to vector<2x256xi32>
    %14 = arith.cmpi slt, %3, %13 : vector<2x256xi32>
    %c2 = arith.constant 2 : index
    %15 = memref.load %arg2[%c2] : memref<4xf32, #tpu.memory_space<smem>>
    %c3 = arith.constant 3 : index
    %16 = memref.load %arg2[%c3] : memref<4xf32, #tpu.memory_space<smem>>
    %17 = vector.broadcast %15 : f32 to vector<2x256xf32>
    %18 = vector.broadcast %16 : f32 to vector<2x256xf32>
    %19 = arith.select %14, %17, %18 : vector<2x256xi1>, vector<2x256xf32>
    %20 = arith.select %5, %12, %19 : vector<2x256xi1>, vector<2x256xf32>
    %21 = vector.extract_strided_slice %20 {offsets = [0, 0], sizes = [2, 128], strides = [1, 1]} : vector<2x256xf32> to vector<2x128xf32>
    %22 = vector.extract_strided_slice %20 {offsets = [0, 128], sizes = [2, 128], strides = [1, 1]} : vector<2x256xf32> to vector<2x128xf32>
    %23 = arith.addf %21, %22 : vector<2x128xf32>
    %c0_3 = arith.constant 0 : index
    %c0_4 = arith.constant 0 : index
    %24 = vector.load %arg4[%c0_3, %c0_4] : memref<2x128xf32, #tpu.memory_space<vmem>>, vector<2x128xf32>
    %25 = arith.addf %24, %23 : vector<2x128xf32>
    %c0_5 = arith.constant 0 : index
    %c0_6 = arith.constant 0 : index
    %26 = vector.load %arg4[%c0_5, %c0_6] : memref<2x128xf32, #tpu.memory_space<vmem>>, vector<2x128xf32>
    tpu.vector_store %arg4[%c0_5, %c0_6], %25 {strides = array<i32>} : memref<2x128xf32, #tpu.memory_space<vmem>>, vector<2x128xf32>,
    return
  }
  func.func @transform_0(%arg0: i32, %arg1: i32) -> i32 {
    %c0_i32 = arith.constant 0 : i32
    %c0_i32_0 = arith.constant 0 : i32
    return %c0_i32 : i32
  }
  func.func @transform_1(%arg0: i32, %arg1: i32) -> (i32, i32) {
    %c0_i32 = arith.constant 0 : i32
    return %arg0, %arg1 : i32, i32
  }
  func.func @transform_2(%arg0: i32, %arg1: i32) -> (i32, i32) {
    %c0_i32 = arith.constant 0 : i32
    %c0_i32_0 = arith.constant 0 : i32
    return %arg0, %c0_i32 : i32, i32
  }
}

</mosaic_0001>

<bundles_post_ra>
// kernel: tpu_custom_call.1
= control target key start
LH: loop header
LB: loop body
LE: loop exit
PB: predicated region body
PF: predicated region fallthrough
CT: control target
= control target key end

     0   :  { %7 = vsyncpa [#allocation5], 0  ;;  %s185_s0 = inlined_call_operand.hbm [shape: f32[4], index: 0, kind: input, shape index: {}]   ;;  %s186_s1 = inlined_call_operand.hbm [shape: s32[2,256], index: 1, kind: input, shape index: {}]   ;;  %s187_s2 = inlined_call_operand.hbm [shape: f32[2,128], index: 2, kind: output, shape index: {}]  }
   0x1   :  { %8 = vsyncpa [#allocation3], 0 }
   0x2   :  { %9 = vsyncpa [#allocation4], 0  ;;  %s15_s11 = sshll.u32 %s185_s0, 4  ;;  %s24_s14 = sshll.u32 %s186_s1, 4  ;;  %s16_s11 = int_to_ptr.hbm [resolvable:$true] %s15_s11  ;;  %s25_s14 = int_to_ptr.hbm [resolvable:$true] %s24_s14 }
   0x3   :  { %s157_s15 = smov [#allocation2]   ;;  %s158_s16 = smov [#allocation6]  }
   0x4   :  { %18 = dma.hbm_to_smem %s16_s11, 16, %s157_s15, [#allocation5]  }
   0x5   :  { %s26_s17 = sshll.u32 %s158_s16, 4  ;;  %s27_s17 = int_to_ptr.vmem [resolvable:$true] %s26_s17 }
   0x6   :  { %29 = dma.hbm_to_vmem [thread:$0]  %s25_s14, 64, %s27_s17, [#allocation3]  }
   0x7   :  { %151 = dma.done.wait [#allocation5], 16  }
   0x8   :  { %152 = vsyncadd [#allocation5], 4294967280 }
   0x9   :  { %153 = dma.done.wait [#allocation3], 64  }
   0xa   :  { %154 = vsyncadd [#allocation3], 4294967232 }
   0xb   :  { %38 = sfence }
   0xc   :  { %s47_s18 = sld [smem:[#allocation2]]  ;;  %v159_v0 = vmov 0.0   ;;  %v44_v1 = vld [vmem:[#allocation6] sm:$0xf]  ;;  %s160_s1 = smov [#allocation7]  }
   0xd   :  { %43 = vst [vmem:[#allocation7] sm:$0x3] %v159_v0  ;;  %s84_s0 = sld [smem:[#allocation2 + $0x1]]  ;;  %vm46_vm0 = vcmp.lt.s32.totalorder %v44_v1, 1  ;;  %vm52_vm1 = vcmp.lt.s32.totalorder %v44_v1, 3  ;;  %vm45_vm2 = vcmp.lt.s32.totalorder %v44_v1, 2 }
   0xe   :  { %s85_s19 = sld [smem:[#allocation2 + $0x2]]  ;;  %s71_s21 = sshll.u32 %s160_s1, 4  ;;  %s72_s21 = int_to_ptr.vmem [resolvable:$true] %s71_s21 }
   0xf   :  { %s86_s20 = sld [smem:[#allocation2 + $0x3]]  ;;  %s73_s24 = sshll.u32 %s187_s2, 4  ;;  %s74_s24 = int_to_ptr.hbm [resolvable:$true] %s73_s24 }
  0x12   :  { %v49_v2 = vstv %s47_s18 }
  0x13   :  { %v50_v3 = vstv %s84_s0 }
  0x14   :  { %v51_v4 = vsel %vm46_vm0, %v49_v2, %v50_v3  ;;  %v55_v5 = vstv %s85_s19  ;;  %v63_v10 = vld [vmem:[#allocation7] sm:$0x3] }
  0x15   :  { %v56_v6 = vstv %s86_s20 }
  0x16   :  { %v57_v7 = vsel %vm52_vm1, %v55_v5, %v56_v6 }
  0x17   :  { %v58_v8 = vsel %vm45_vm2, %v51_v4, %v57_v7 }
  0x18   :  { %v60_v9 = vrot.slane %v58_v8, 2 }
  0x1a   :  { %v62_v11 = vadd.f32 %v60_v9, %v58_v8 }
  0x1c   :  { %v64_v12 = vadd.f32 %v63_v10, %v62_v11 }
  0x1e   :  { %65 = vst [vmem:[#allocation7] sm:$0x3] %v64_v12 }
  0x1f   :  { %76 = dma.vmem_to_hbm [thread:$0]  %s72_s21, 32, %s74_s24, [#allocation4]  }
  0x20   :  { %155 = dma.done.wait [#allocation4], 32  }
  0x21   :  { %156 = vsyncadd [#allocation4], 4294967264 }
  0x22   :  { %81 = vsyncpa [#allocation3], 1 }
  0x23   :  { %82 = vsyncpa [#allocation4], 1 }
  0x24   :  { %83 = vsyncpa [#allocation5], 1 }

</bundles_post_ra>
